<compile_context>
chip_gen: v6e
topology: v6e:2x2x1
jax: 0.10.0
libtpu: 0.0.40
codegen_flags: <defaults>
</compile_context>

<pallas_src>
import jax
import jax.numpy as jnp
from jax.experimental import pallas as pl
from jax.experimental.pallas import tpu as pltpu


def _copy_kernel(pos_ref, out_ref, sem):
    # Pure passthrough: forward(x) == pos_emb, via a single HBM->HBM DMA.
    cp = pltpu.make_async_copy(pos_ref, out_ref, sem)
    cp.start()
    cp.wait()


def learnable_positional_encoding_2d(pos_emb, x=None):
    """Forward pass of LearnablePositionalEncoding2D.

    Args:
      pos_emb: (n_patch*n_patch, emb_dim) learnable positional embedding.
      x: optional input (ignored, matching the PyTorch module).

    Returns:
      Array identical to pos_emb, produced through a Pallas TPU copy kernel.
    """
    del x  # forward() ignores its input
    seq, emb = pos_emb.shape
    nbytes = seq * emb * jnp.dtype(pos_emb.dtype).itemsize

    return pl.pallas_call(
        _copy_kernel,
        out_shape=jax.ShapeDtypeStruct((seq, emb), pos_emb.dtype),
        # Leave both arrays in place (HBM); the kernel DMAs directly between
        # them without ever touching VMEM or vregs.
        in_specs=[pl.BlockSpec(memory_space=pl.ANY)],
        out_specs=pl.BlockSpec(memory_space=pl.ANY),
        scratch_shapes=[pltpu.SemaphoreType.DMA(())],
        cost_estimate=pl.CostEstimate(
            flops=0,
            transcendentals=0,
            bytes_accessed=2 * nbytes,  # one read + one write of pos_emb
        ),
    )(pos_emb)


if __name__ == "__main__":
    # Module hyperparameters (small, consistent with the forward).
    n_patch = 4
    emb_dim = 32

    key = jax.random.PRNGKey(0)
    k_pos, k_x = jax.random.split(key)

    # Deterministic parameter values (shape matches the module exactly:
    # (n_patch*n_patch, emb_dim)); random so the copy is nontrivial.
    pos_emb = jax.random.normal(k_pos, (n_patch * n_patch, emb_dim), jnp.float32)

    # The forward ignores x, but construct one anyway (NCHW like PyTorch).
    x = jax.random.normal(k_x, (2, 4, 16, 16), jnp.float32)

    out = learnable_positional_encoding_2d(pos_emb, x)
    out = jax.block_until_ready(out)

    assert out.shape == (n_patch * n_patch, emb_dim), out.shape
    assert out.dtype == pos_emb.dtype
    assert bool(jnp.allclose(out, pos_emb)), "kernel output != pos_emb"

    print("KERNEL_OK")
</pallas_src>

<mosaic_0001>
module attributes {stable_mosaic.version = 11 : i64} {
  func.func @_copy_kernel(%arg0: memref<16x32xf32, #tpu.memory_space<any>>, %arg1: memref<16x32xf32, #tpu.memory_space<any>>, %arg2: memref<!tpu.dma_semaphore, #tpu.memory_space<semaphore_mem>>) attributes {dimension_semantics = [], scalar_prefetch = 0 : i64, scratch_operands = 1 : i64, tpu.core_type = #tpu.core_type<tc>} {
    tpu.enqueue_dma source(%arg0 : memref<16x32xf32, #tpu.memory_space<any>>) target(%arg1 : memref<16x32xf32, #tpu.memory_space<any>>) target_semaphore(%arg2 : memref<!tpu.dma_semaphore, #tpu.memory_space<semaphore_mem>>)
    tpu.wait_dma2 semaphore(%arg2 : memref<!tpu.dma_semaphore, #tpu.memory_space<semaphore_mem>>) src(%arg0 : memref<16x32xf32, #tpu.memory_space<any>>) dst(%arg1 : memref<16x32xf32, #tpu.memory_space<any>>)
    return
  }
}

</mosaic_0001>

<bundles_post_ra>
// kernel: tpu_custom_call.1
= control target key start
LH: loop header
LB: loop body
LE: loop exit
PB: predicated region body
PF: predicated region fallthrough
CT: control target
= control target key end

     0   :  { %s28_s6 = smov [#allocation2]   ;;  %s29_s7 = smov 131072   ;;  %s47_s0 = inlined_call_operand.hbm [shape: f32[16,32], index: 0, kind: input, shape index: {}]   ;;  %s48_s1 = inlined_call_operand.hbm [shape: f32[16,32], index: 1, kind: output, shape index: {}]  }
   0x1   :  { %s30_s8 = smov 0  }
   0x2   :  { %12 = dma.general %s47_s0, 256, %s48_s1, %s28_s6, %s29_s7, [#allocation4], %s30_s8, 0  }
   0x3   :  { %26 = dma.done.wait [#allocation2], 256 }
   0x4   :  { %27 = vsyncadd [#allocation2], 4294967040 }
   0x5   :  { %16 = vsyncmov [#allocation2] }
   0x8   :  { %s17_s13 = vpop.sfrf %16 }
   0x9   :  { %p22_p0 = scmp.ne.s32.totalorder %s17_s13, 0 }
   0xb   :  { %21 = shalt.err (%p22_p0)  }

</bundles_post_ra>
